<compile_context>
chip_gen: v7x
topology: tpu7x:2x2x1
jax: 0.10.0
libtpu: 0.0.40
codegen_flags: <defaults>
</compile_context>

<pallas_src>
import jax
import jax.numpy as jnp
from jax.experimental import pallas as pl
from jax.experimental.pallas import tpu as pltpu


HIDDEN = 30      # matches nn.Linear(s_dim, 30) in the PyTorch module
LANE = 128       # TPU lane width
SUBLANE = 8      # TPU sublane width (f32)


def _round_up(n, m):
    return ((n + m - 1) // m) * m


def anet_kernel(x_ref, w1_ref, b1_ref, w2_ref, b2_ref, out_ref):
    """Fused MLP forward on one batch tile: (x@W1+b1) -> relu -> (@W2+b2) -> tanh."""
    x = x_ref[...]                                        # (TB, S_pad)
    h = jnp.dot(x, w1_ref[...],
                preferred_element_type=jnp.float32)       # (TB, H_pad)  MXU
    h = h + b1_ref[...]                                   # broadcast (1, H_pad)
    h = jnp.maximum(h, 0.0)                               # ReLU (VPU)
    o = jnp.dot(h, w2_ref[...],
                preferred_element_type=jnp.float32)       # (TB, A_pad)  MXU
    o = o + b2_ref[...]                                   # broadcast (1, A_pad)
    out_ref[...] = jnp.tanh(o)                            # tanh (EUP)


def anet_forward(x, w1, b1, w2, b2, *, max_block_batch=512):
    """Pad to lane-dense shapes, tile the batch axis, run the fused kernel.

    x : (B, s_dim) f32
    w1: (s_dim, HIDDEN) f32, b1: (1, HIDDEN) f32
    w2: (HIDDEN, a_dim) f32, b2: (1, a_dim) f32
    returns (B, a_dim) f32
    """
    batch, s_dim = x.shape
    hidden, a_dim = w2.shape

    # Lane-dense padded feature dims (exact: padded cols are zero, tanh(0)=0).
    s_pad = _round_up(s_dim, LANE)
    h_pad = _round_up(hidden, LANE)
    a_pad = _round_up(a_dim, LANE)

    # Batch tile: multiple of 8 sublanes, capped at max_block_batch.
    tb = min(max_block_batch, _round_up(batch, SUBLANE))
    b_pad = _round_up(batch, tb)

    f32 = jnp.float32
    xp = jnp.zeros((b_pad, s_pad), f32).at[:batch, :s_dim].set(x.astype(f32))
    w1p = jnp.zeros((s_pad, h_pad), f32).at[:s_dim, :hidden].set(w1.astype(f32))
    b1p = jnp.zeros((1, h_pad), f32).at[:, :hidden].set(b1.astype(f32))
    w2p = jnp.zeros((h_pad, a_pad), f32).at[:hidden, :a_dim].set(w2.astype(f32))
    b2p = jnp.zeros((1, a_pad), f32).at[:, :a_dim].set(b2.astype(f32))

    grid = (b_pad // tb,)

    out_padded = pl.pallas_call(
        anet_kernel,
        out_shape=jax.ShapeDtypeStruct((b_pad, a_pad), f32),
        grid=grid,
        in_specs=[
            # activations walk the batch axis
            pl.BlockSpec((tb, s_pad), lambda i: (i, 0)),
            # weights / biases: constant block index -> resident in VMEM
            pl.BlockSpec((s_pad, h_pad), lambda i: (0, 0)),
            pl.BlockSpec((1, h_pad), lambda i: (0, 0)),
            pl.BlockSpec((h_pad, a_pad), lambda i: (0, 0)),
            pl.BlockSpec((1, a_pad), lambda i: (0, 0)),
        ],
        out_specs=pl.BlockSpec((tb, a_pad), lambda i: (i, 0)),
        compiler_params=pltpu.CompilerParams(
            dimension_semantics=("parallel",),   # v7x: shard batch over 2 TCs
        ),
    )(xp, w1p, b1p, w2p, b2p)

    # Slice padded rows / lanes back to the logical output.
    return out_padded[:batch, :a_dim]


def init_params(key, s_dim, a_dim):
    """Synthetic init matching the module's shapes (weights ~ N(0, 0.1))."""
    k1, k2, k3, k4 = jax.random.split(key, 4)
    w1 = (0.1 * jax.random.normal(k1, (s_dim, HIDDEN))).astype(jnp.float32)
    b1 = (0.1 * jax.random.normal(k2, (1, HIDDEN))).astype(jnp.float32)
    w2 = (0.1 * jax.random.normal(k3, (HIDDEN, a_dim))).astype(jnp.float32)
    b2 = (0.1 * jax.random.normal(k4, (1, a_dim))).astype(jnp.float32)
    return w1, b1, w2, b2


def reference_forward(x, w1, b1, w2, b2):
    """Pure-JAX reference for a sanity check."""
    h = jnp.maximum(x @ w1 + b1, 0.0)
    return jnp.tanh(h @ w2 + b2)


if __name__ == "__main__":
    s_dim, a_dim, batch = 16, 4, 8

    key = jax.random.PRNGKey(0)
    kx, kp = jax.random.split(key)
    x = jax.random.normal(kx, (batch, s_dim), dtype=jnp.float32)
    w1, b1, w2, b2 = init_params(kp, s_dim, a_dim)

    out = anet_forward(x, w1, b1, w2, b2)
    out = jax.block_until_ready(out)

    ref = reference_forward(x, w1, b1, w2, b2)
    assert out.shape == (batch, a_dim)
    assert jnp.allclose(out, ref, atol=1e-5, rtol=1e-5)

    print("KERNEL_OK")
</pallas_src>

<mosaic_0001>
module attributes {stable_mosaic.version = 11 : i64} {
  func.func @anet_kernel(%arg0: i32, %arg1: memref<8x128xf32, #tpu.memory_space<vmem>>, %arg2: memref<128x128xf32, #tpu.memory_space<vmem>>, %arg3: memref<1x128xf32, #tpu.memory_space<vmem>>, %arg4: memref<128x128xf32, #tpu.memory_space<vmem>>, %arg5: memref<1x128xf32, #tpu.memory_space<vmem>>, %arg6: memref<8x128xf32, #tpu.memory_space<vmem>>) attributes {dimension_semantics = [#tpu.dimension_semantics<parallel>], iteration_bounds = array<i64: 1>, scalar_prefetch = 0 : i64, scratch_operands = 0 : i64, tpu.core_type = #tpu.core_type<tc>, window_params = [{transform_indices = @transform_0, window_bounds = array<i64: 8, 128>}, {pipeline_mode = #tpu.pipeline_mode<synchronous>, transform_indices = @transform_1, window_bounds = array<i64: 128, 128>}, {pipeline_mode = #tpu.pipeline_mode<synchronous>, transform_indices = @transform_2, window_bounds = array<i64: 1, 128>}, {pipeline_mode = #tpu.pipeline_mode<synchronous>, transform_indices = @transform_3, window_bounds = array<i64: 128, 128>}, {pipeline_mode = #tpu.pipeline_mode<synchronous>, transform_indices = @transform_4, window_bounds = array<i64: 1, 128>}, {transform_indices = @transform_5, window_bounds = array<i64: 8, 128>}]} {
    %c0 = arith.constant 0 : index
    %c0_0 = arith.constant 0 : index
    %0 = vector.load %arg1[%c0, %c0_0] : memref<8x128xf32, #tpu.memory_space<vmem>>, vector<8x128xf32>
    %c0_1 = arith.constant 0 : index
    %c0_2 = arith.constant 0 : index
    %1 = vector.load %arg2[%c0_1, %c0_2] : memref<128x128xf32, #tpu.memory_space<vmem>>, vector<128x128xf32>
    %cst = arith.constant dense<0.000000e+00> : vector<8x128xf32>
    %2 = tpu.matmul %0, %1, %cst {dimension_numbers = #tpu.dot_dimension_numbers<[1], [0], [0], [1], [0, 0, 1, 1], [], []>} : vector<8x128xf32>, vector<128x128xf32>, vector<8x128xf32> -> vector<8x128xf32>
    %c0_3 = arith.constant 0 : index
    %c0_4 = arith.constant 0 : index
    %3 = vector.load %arg3[%c0_3, %c0_4] : memref<1x128xf32, #tpu.memory_space<vmem>>, vector<1x128xf32>
    %4 = vector.broadcast %3 : vector<1x128xf32> to vector<8x128xf32>
    %5 = arith.addf %2, %4 : vector<8x128xf32>
    %cst_5 = arith.constant 0.000000e+00 : f32
    %6 = vector.broadcast %cst_5 : f32 to vector<8x128xf32>
    %7 = arith.maximumf %5, %6 : vector<8x128xf32>
    %c0_6 = arith.constant 0 : index
    %c0_7 = arith.constant 0 : index
    %8 = vector.load %arg4[%c0_6, %c0_7] : memref<128x128xf32, #tpu.memory_space<vmem>>, vector<128x128xf32>
    %cst_8 = arith.constant dense<0.000000e+00> : vector<8x128xf32>
    %9 = tpu.matmul %7, %8, %cst_8 {dimension_numbers = #tpu.dot_dimension_numbers<[1], [0], [0], [1], [0, 0, 1, 1], [], []>} : vector<8x128xf32>, vector<128x128xf32>, vector<8x128xf32> -> vector<8x128xf32>
    %c0_9 = arith.constant 0 : index
    %c0_10 = arith.constant 0 : index
    %10 = vector.load %arg5[%c0_9, %c0_10] : memref<1x128xf32, #tpu.memory_space<vmem>>, vector<1x128xf32>
    %11 = vector.broadcast %10 : vector<1x128xf32> to vector<8x128xf32>
    %12 = arith.addf %9, %11 : vector<8x128xf32>
    %13 = math.tanh %12 : vector<8x128xf32>
    %c0_11 = arith.constant 0 : index
    %c0_12 = arith.constant 0 : index
    %14 = vector.load %arg6[%c0_11, %c0_12] : memref<8x128xf32, #tpu.memory_space<vmem>>, vector<8x128xf32>
    tpu.vector_store %arg6[%c0_11, %c0_12], %13 {strides = array<i32>} : memref<8x128xf32, #tpu.memory_space<vmem>>, vector<8x128xf32>,
    return
  }
  func.func @transform_0(%arg0: i32) -> (i32, i32) {
    %c0_i32 = arith.constant 0 : i32
    %c0_i32_0 = arith.constant 0 : i32
    return %arg0, %c0_i32 : i32, i32
  }
  func.func @transform_1(%arg0: i32) -> (i32, i32) {
    %c0_i32 = arith.constant 0 : i32
    %c0_i32_0 = arith.constant 0 : i32
    %c0_i32_1 = arith.constant 0 : i32
    return %c0_i32, %c0_i32_0 : i32, i32
  }
  func.func @transform_2(%arg0: i32) -> (i32, i32) {
    %c0_i32 = arith.constant 0 : i32
    %c0_i32_0 = arith.constant 0 : i32
    %c0_i32_1 = arith.constant 0 : i32
    return %c0_i32, %c0_i32_0 : i32, i32
  }
  func.func @transform_3(%arg0: i32) -> (i32, i32) {
    %c0_i32 = arith.constant 0 : i32
    %c0_i32_0 = arith.constant 0 : i32
    %c0_i32_1 = arith.constant 0 : i32
    return %c0_i32, %c0_i32_0 : i32, i32
  }
  func.func @transform_4(%arg0: i32) -> (i32, i32) {
    %c0_i32 = arith.constant 0 : i32
    %c0_i32_0 = arith.constant 0 : i32
    %c0_i32_1 = arith.constant 0 : i32
    return %c0_i32, %c0_i32_0 : i32, i32
  }
  func.func @transform_5(%arg0: i32) -> (i32, i32) {
    %c0_i32 = arith.constant 0 : i32
    %c0_i32_0 = arith.constant 0 : i32
    return %arg0, %c0_i32 : i32, i32
  }
}

</mosaic_0001>

<bundles_post_ra>
// kernel: tpu_custom_call.1
= control target key start
LH: loop header
LB: loop body
LE: loop exit
PB: predicated region body
PF: predicated region fallthrough
CT: control target
= control target key end

     0   :  { %10 = vsyncpa [#allocation3], 0  ;;  %s640_s0 = inlined_call_operand.hbm [shape: f32[8,128], index: 0, kind: input, shape index: {}]   ;;  %s641_s1 = inlined_call_operand.hbm [shape: f32[128,128], index: 1, kind: input, shape index: {}]   ;;  %s642_s2 = inlined_call_operand.vmem [shape: f32[1,128], index: 2, kind: input, shape index: {}]   ;;  %s643_s3 = inlined_call_operand.hbm [shape: f32[128,128], index: 3, kind: input, shape index: {}]   ;;  %s644_s4 = inlined_call_operand.vmem [shape: f32[1,128], index: 4, kind: input, shape index: {}]   ;;  %s645_s5 = inlined_call_operand.hbm [shape: f32[8,128], index: 5, kind: output, shape index: {}]  }
   0x1   :  { %11 = vsyncpa [#allocation6], 0 }
   0x2   :  { %12 = vsyncpa [#allocation4], 0  ;;  %s525_s18 = smov [#allocation5]   ;;  %s431_s22 = scalar_lea.hbm %s641_s1, 2048 }
   0x3   :  { %s28_s19 = sshll.u32 %s525_s18, 4  ;;  %p432_p0 = scmp.ne.s32.totalorder %s641_s1, %s431_s22  ;;  %s29_s19 = int_to_ptr.vmem [resolvable:$true] %s28_s19 }
   0x4   :  { %p435_p1 = scmp.lt.u32.totalorder %s431_s22, %s641_s1 }
   0x6   :  { %p437_p2 = pnand %p435_p1, %p432_p0 }
   0x8   :  { %440 = shalt.err (!%p437_p2)
}
   0x9   :  { %s441_s27 = scalar_lea.vmem %s29_s19, 2048  ;;  %p446_p4 = scmp.lt.s32.totalorder %s29_s19, %s29_s19 }
   0xa   :  { %p442_p3 = scmp.ne.s32.totalorder %s29_s19, %s441_s27  ;;  %p447_p5 = scmp.lt.s32.totalorder %s441_s27, %s441_s27 }
   0xc   :  { %p448_p6 = por %p447_p5, %p446_p4 }
   0xe   :  { %p449_p7 = pnand %p448_p6, %p442_p3 }
  0x10   :  { %452 = shalt.err (!%p449_p7)
}
  0x11   :  { %s526_s28 = smov 128   ;;  %s527_s29 = smov 8  }
  0x12   :  { %34 = dma.hbm_to_vmem [thread:$0]  %s641_s1, 2048, %s29_s19, [#allocation6], %s526_s28, %s526_s28, %s527_s29  }
  0x13   :  { %s528_s7 = smov [#allocation2]   ;;  %s529_s9 = smov [#allocation7]  }
  0x14   :  { %s19_s8 = sshll.u32 %s528_s7, 4  ;;  %s42_s10 = sshll.u32 %s529_s9, 4  ;;  %s20_s8 = int_to_ptr.vmem [resolvable:$true] %s19_s8  ;;  %s43_s10 = int_to_ptr.vmem [resolvable:$true] %s42_s10 }
  0x15   :  { %s453_s13 = scalar_lea.hbm %s640_s0, 128 }
  0x16   :  { %p454_p8 = scmp.ne.s32.totalorder %s640_s0, %s453_s13  ;;  %p457_p9 = scmp.lt.u32.totalorder %s453_s13, %s640_s0 }
  0x18   :  { %p459_p10 = pnand %p457_p9, %p454_p8 }
  0x1a   :  { %462 = shalt.err (!%p459_p10)
}
  0x1b   :  { %s463_s1 = scalar_lea.vmem %s20_s8, 128  ;;  %p468_p12 = scmp.lt.s32.totalorder %s20_s8, %s20_s8 }
  0x1c   :  { %p464_p11 = scmp.ne.s32.totalorder %s20_s8, %s463_s1  ;;  %p469_p13 = scmp.lt.s32.totalorder %s463_s1, %s463_s1 }
  0x1e   :  { %p470_p0 = por %p469_p13, %p468_p12 }
  0x20   :  { %p471_p1 = pnand %p470_p0, %p464_p11 }
  0x22   :  { %474 = shalt.err (!%p471_p1)
}
  0x23   :  { %22 = dma.hbm_to_vmem [thread:$0]  %s640_s0, 128, %s20_s8, [#allocation3]  }
  0x24   :  { %s475_s22 = scalar_lea.hbm %s643_s3, 2048 }
  0x25   :  { %p476_p2 = scmp.ne.s32.totalorder %s643_s3, %s475_s22  ;;  %p479_p3 = scmp.lt.u32.totalorder %s475_s22, %s643_s3 }
  0x27   :  { %p481_p4 = pnand %p479_p3, %p476_p2 }
  0x29   :  { %484 = shalt.err (!%p481_p4)
}
  0x2a   :  { %s485_s27 = scalar_lea.vmem %s43_s10, 2048  ;;  %p490_p6 = scmp.lt.s32.totalorder %s43_s10, %s43_s10 }
  0x2b   :  { %p486_p5 = scmp.ne.s32.totalorder %s43_s10, %s485_s27  ;;  %p491_p7 = scmp.lt.s32.totalorder %s485_s27, %s485_s27 }
  0x2d   :  { %p492_p8 = por %p491_p7, %p490_p6 }
  0x2f   :  { %p493_p9 = pnand %p492_p8, %p486_p5 }
  0x31   :  { %496 = shalt.err (!%p493_p9)
}
  0x32   :  { %48 = dma.hbm_to_vmem [thread:$0]  %s643_s3, 2048, %s43_s10, [#allocation6], %s526_s28, %s526_s28, %s527_s29  }
  0x33   :  { %519 = dma.done.wait [#allocation3], 128  }
  0x34   :  { %520 = vsyncadd [#allocation3], 4294967168 }
  0x35   :  { %521 = dma.done.wait [#allocation6], 4096  }
  0x36   :  { %522 = vsyncadd [#allocation6], 4294963200  ;;  %v530_v0 = vmov 0.0|0.0   ;;  %vm531_vm0 = vmmov 0   ;;  %v532_v1 = vmov 0.0   ;;  %v61_v2 = vld [vmem:[#allocation5] sm:$0xff] }
  0x37   :  { %372 = vmatprep.subr.bf16.mxu0 %v530_v0  ;;  %334 = vmatprep.mubr.msk.f32.mxu0 %vm531_vm0, %v532_v1  ;;  %v62_v3 = vld [vmem:[#allocation5 + $0x8] sm:$0xff]  ;;  %v63_v4 = vld [vmem:[#allocation5 + $0x10] sm:$0xff]  ;;  %v64_v6 = vld [vmem:[#allocation5 + $0x18] sm:$0xff]  ;;  %s533_s7 = smov [#allocation8]  }
  0x38   :  { %396 = vmatprep.subr.bf16.mxu1 %v530_v0  ;;  %369 = vmatprep.mubr.msk.f32.mxu1 %vm531_vm0, %v532_v1  ;;  %v373_v5 = vpack.c.bf16 %v62_v3, %v61_v2  ;;  %v376_v7 = vpack.c.bf16 %v64_v6, %v63_v4  ;;  %v65_v8 = vld [vmem:[#allocation5 + $0x20] sm:$0xff]  ;;  %v66_v9 = vld [vmem:[#allocation5 + $0x28] sm:$0xff]  ;;  %v157_v12 = vld [vmem:[#allocation7 + $0x10] sm:$0xff]  ;;  %s256_s8 = sshll.u32 %s533_s7, 4  ;;  %s257_s8 = int_to_ptr.vmem [resolvable:$true] %s256_s8 }
  0x39   :  { %v155_v10 = vld [vmem:[#allocation7] sm:$0xff]  ;;  %v156_v11 = vld [vmem:[#allocation7 + $0x8] sm:$0xff]  ;;  %v158_v13 = vld [vmem:[#allocation7 + $0x18] sm:$0xff]  ;;  %v379_v14 = vpack.c.bf16 %v66_v9, %v65_v8  ;;  %s497_s9 = scalar_lea.vmem %s257_s8, 128  ;;  %p502_p11 = scmp.lt.s32.totalorder %s257_s8, %s257_s8 }
  0x3a   :  { %374 = vmatpush3.bf16.msra.mxu0 %v373_v5  ;;  %v397_v15 = vpack.c.bf16 %v156_v11, %v155_v10  ;;  %v67_v16 = vld [vmem:[#allocation5 + $0x30] sm:$0xff]  ;;  %v68_v17 = vld [vmem:[#allocation5 + $0x38] sm:$0xff]  ;;  %v400_v18 = vpack.c.bf16 %v158_v13, %v157_v12  ;;  %v159_v19 = vld [vmem:[#allocation7 + $0x20] sm:$0xff]  ;;  %p498_p10 = scmp.ne.s32.totalorder %s257_s8, %s497_s9  ;;  %p503_p12 = scmp.lt.s32.totalorder %s497_s9, %s497_s9 }
  0x3b   :  { %375 = vmatprep.subr.bf16.mxu0 %v530_v0  ;;  %v160_v20 = vld [vmem:[#allocation7 + $0x28] sm:$0xff]  ;;  %v382_v21 = vpack.c.bf16 %v68_v17, %v67_v16  ;;  %v69_v22 = vld [vmem:[#allocation5 + $0x40] sm:$0xff]  ;;  %v161_v25 = vld [vmem:[#allocation7 + $0x30] sm:$0xff] }
  0x3c   :  { %398 = vmatpush3.bf16.msra.mxu1 %v397_v15  ;;  %v70_v23 = vld [vmem:[#allocation5 + $0x48] sm:$0xff]  ;;  %v403_v24 = vpack.c.bf16 %v160_v20, %v159_v19  ;;  %v162_v26 = vld [vmem:[#allocation7 + $0x38] sm:$0xff]  ;;  %v71_v28 = vld [vmem:[#allocation5 + $0x50] sm:$0xff]  ;;  %p504_p13 = por %p503_p12, %p502_p11 }
  0x3d   :  { %399 = vmatprep.subr.bf16.mxu1 %v530_v0  ;;  %v385_v27 = vpack.c.bf16 %v70_v23, %v69_v22  ;;  %v72_v29 = vld [vmem:[#allocation5 + $0x58] sm:$0xff]  ;;  %v406_v30 = vpack.c.bf16 %v162_v26, %v161_v25  ;;  %v163_v31 = vld [vmem:[#allocation7 + $0x40] sm:$0xff]  ;;  %v164_v32 = vld [vmem:[#allocation7 + $0x48] sm:$0xff] }
  0x3e   :  { %377 = vmatpush3.bf16.msra.mxu0 %v376_v7  ;;  %v388_v33 = vpack.c.bf16 %v72_v29, %v71_v28  ;;  %v73_v34 = vld [vmem:[#allocation5 + $0x60] sm:$0xff]  ;;  %v74_v35 = vld [vmem:[#allocation5 + $0x68] sm:$0xff]  ;;  %v409_v36 = vpack.c.bf16 %v164_v32, %v163_v31  ;;  %v165_v37 = vld [vmem:[#allocation7 + $0x50] sm:$0xff]  ;;  %p505_p0 = pnand %p504_p13, %p498_p10 }
  0x3f   :  { %378 = vmatprep.subr.bf16.mxu0 %v530_v0  ;;  %v166_v38 = vld [vmem:[#allocation7 + $0x58] sm:$0xff]  ;;  %v391_v39 = vpack.c.bf16 %v74_v35, %v73_v34  ;;  %v75_v40 = vld [vmem:[#allocation5 + $0x70] sm:$0xff]  ;;  %v167_v43 = vld [vmem:[#allocation7 + $0x60] sm:$0xff] }
  0x40   :  { %401 = vmatpush3.bf16.msra.mxu1 %v400_v18  ;;  %v76_v41 = vld [vmem:[#allocation5 + $0x78] sm:$0xff]  ;;  %v412_v42 = vpack.c.bf16 %v166_v38, %v165_v37  ;;  %v168_v44 = vld [vmem:[#allocation7 + $0x68] sm:$0xff]  ;;  %v169_v48 = vld [vmem:[#allocation7 + $0x70] sm:$0xff] }
  0x41   :  { %402 = vmatprep.subr.bf16.mxu1 %v530_v0  ;;  %v394_v45 = vpack.c.bf16 %v76_v41, %v75_v40  ;;  %v415_v46 = vpack.c.bf16 %v168_v44, %v167_v43  ;;  %v60_v47 = vld [vmem:[#allocation2] sm:$0xff] }
  0x42   :  { %380 = vmatpush3.bf16.msra.mxu0 %v379_v14  ;;  %v170_v49 = vld [vmem:[#allocation7 + $0x78] sm:$0xff] }
  0x43   :  { %381 = vmatprep.subr.bf16.mxu0 %v530_v0  ;;  %v418_v50 = vpack.c.bf16 %v170_v49, %v169_v48  ;;  %v266_v51 = vld [vmem:[%s642_s2] ss:$0 sm:$0xff] }
  0x44   :  { %404 = vmatpush3.bf16.msra.mxu1 %v403_v24  ;;  %v267_v56 = vld [vmem:[%s644_s4] ss:$0 sm:$0xff] }
  0x45   :  { %405 = vmatprep.subr.bf16.mxu1 %v530_v0 }
  0x46   :  { %383 = vmatpush3.bf16.msra.mxu0 %v382_v21 }
  0x47   :  { %384 = vmatprep.subr.bf16.mxu0 %v530_v0 }
  0x48   :  { %407 = vmatpush3.bf16.msra.mxu1 %v406_v30 }
  0x49   :  { %408 = vmatprep.subr.bf16.mxu1 %v530_v0 }
  0x4a   :  { %386 = vmatpush3.bf16.msra.mxu0 %v385_v27 }
  0x4b   :  { %387 = vmatprep.subr.bf16.mxu0 %v530_v0 }
  0x4c   :  { %410 = vmatpush3.bf16.msra.mxu1 %v409_v36 }
  0x4d   :  { %411 = vmatprep.subr.bf16.mxu1 %v530_v0 }
  0x4e   :  { %389 = vmatpush3.bf16.msra.mxu0 %v388_v33 }
  0x4f   :  { %390 = vmatprep.subr.bf16.mxu0 %v530_v0 }
  0x50   :  { %413 = vmatpush3.bf16.msra.mxu1 %v412_v42 }
  0x51   :  { %414 = vmatprep.subr.bf16.mxu1 %v530_v0 }
  0x52   :  { %392 = vmatpush3.bf16.msra.mxu0 %v391_v39 }
  0x53   :  { %393 = vmatprep.subr.bf16.mxu0 %v530_v0 }
  0x54   :  { %416 = vmatpush3.bf16.msra.mxu1 %v415_v46 }
  0x55   :  { %417 = vmatprep.subr.bf16.mxu1 %v530_v0 }
  0x56   :  { %395 = vmatpush3.bf16.msra.mxu0 %v394_v45 }
  0x58   :  { %419 = vmatpush3.bf16.msra.mxu1 %v418_v50 }
  0x59   :  { %335 = vmatmul.mubr.f32.vlgmr.msra.gmra.mrb[0].mxu0 %v60_v47 }
 0x12c   :  { %v150_v52 = vpop.f32.mrb[0].mxu0 }
 0x12d   :  { %v151_v53 = vadd.f32 %v266_v51, %v150_v52  ;;  %v336_v54 = vpop.f32.mrb[1].mxu0 }
 0x12f   :  { %v154_v55 = vmax.f32 %v151_v53, 0.0 }
 0x131   :  { %370 = vmatmul.mubr.f32.vlgmr.msra.gmra.mrb[0].mxu1 %v154_v55 }
 0x204   :  { %v244_v57 = vpop.f32.mrb[0].mxu1 }
 0x205   :  { %v245_v58 = vadd.f32 %v267_v56, %v244_v57  ;;  %v371_v59 = vpop.f32.mrb[1].mxu1 }
 0x207   :  { %429 = vtanh.f32 %v245_v58 }
 0x211   :  { %v430_v60 = vpop.eup %429 }
 0x212   :  { %249 = vst [vmem:[#allocation8] sm:$0xff] %v430_v60 }
 0x213   :  { %508 = shalt.err (!%p505_p0)
}
 0x214   :  { %s509_s4 = scalar_lea.hbm %s645_s5, 128 }
 0x215   :  { %p510_p1 = scmp.ne.s32.totalorder %s645_s5, %s509_s4  ;;  %p513_p2 = scmp.lt.u32.totalorder %s509_s4, %s645_s5 }
 0x217   :  { %p515_p3 = pnand %p513_p2, %p510_p1 }
 0x219   :  { %518 = shalt.err (!%p515_p3)
}
 0x21a   :  { %259 = dma.vmem_to_hbm [thread:$0]  %s257_s8, 128, %s645_s5, [#allocation4]  }
 0x21b   :  { %523 = dma.done.wait [#allocation4], 128  }
 0x21c   :  { %524 = vsyncadd [#allocation4], 4294967168 }
 0x21d   :  { %263 = vsyncpa [#allocation3], 1 }
 0x21e   :  { %264 = vsyncpa [#allocation6], 1 }
 0x21f   :  { %265 = vsyncpa [#allocation4], 1 }

</bundles_post_ra>
